<compile_context>
chip_gen: v7x
topology: tpu7x:2x2x1
jax: 0.10.0
libtpu: 0.0.40
codegen_flags: <defaults>
</compile_context>

<pallas_src>
import jax
import jax.numpy as jnp
from jax import lax
from jax.experimental import pallas as pl
from jax.experimental.pallas import tpu as pltpu

EPS = 1e-10
NOISE_LEVEL = 0.1
TWO_PI = 6.283185307179586


def _l2norm_kernel(x_ref, bits_ref, o_ref):
    # x_ref / o_ref: (C, T) tiles; bits_ref: (C, T) uint32 random bits.
    x = x_ref[...].astype(jnp.float32)

    # norm = sqrt(sum(x^2, dim=channels)) + eps  -> shape (1, T)
    norm = jnp.sqrt(jnp.sum(x * x, axis=0, keepdims=True)) + EPS
    scale = 2.0 / norm            # T divides instead of C*T
    y = x * scale

    # Paired Box-Muller: half the tile's bits -> magnitudes, half -> angles.
    bits = bits_ref[...]
    half = bits.shape[-1] // 2    # static; T is a multiple of 256 so half is 128-aligned
    b1 = bits[:, :half]
    b2 = bits[:, half:]
    exp_one = jnp.uint32(0x3F800000)  # exponent bits of 1.0f
    # Mantissa trick: force exponent of 1.0 -> float32 in [1, 2).
    v1 = lax.bitcast_convert_type((b1 >> 9) | exp_one, jnp.float32)
    v2 = lax.bitcast_convert_type((b2 >> 9) | exp_one, jnp.float32)
    u1 = 2.0 - v1                 # in (0, 1]; never 0 -> log is safe
    theta = TWO_PI * (v2 - 1.0)   # in [0, 2*pi)
    r = jnp.sqrt(-2.0 * jnp.log(u1))
    noise = jnp.concatenate([r * jnp.cos(theta), r * jnp.sin(theta)], axis=-1)

    o_ref[...] = (y + NOISE_LEVEL * noise).astype(o_ref.dtype)


def _round_up(v, m):
    return (v + m - 1) // m * m


def l2norm_pallas(x, key):
    """x: (B, C, H, W) float array; key: jax PRNG key.  Returns same shape/dtype."""
    B, C, H, W = x.shape
    HW = H * W

    # Lane-dense spatial tile: multiple of 256 (Box-Muller halves stay 128-aligned),
    # capped so per-step VMEM (x + bits + out tiles, double-buffered) stays small
    # across generations.
    hw_pad = _round_up(HW, 256)
    vmem_cap = max(256, ((4 * 1024 * 1024) // (4 * C)) // 256 * 256)
    t_hw = min(2048, hw_pad, vmem_cap)
    hw_pad = _round_up(HW, t_hw)

    xr = x.reshape(B, C, HW)
    if hw_pad != HW:
        xr = jnp.pad(xr, ((0, 0), (0, 0), (0, hw_pad - HW)))
    bits = jax.random.bits(key, (B, C, hw_pad), dtype=jnp.uint32)

    out = pl.pallas_call(
        _l2norm_kernel,
        out_shape=jax.ShapeDtypeStruct((B, C, hw_pad), x.dtype),
        grid=(B, hw_pad // t_hw),
        in_specs=[
            pl.BlockSpec((None, C, t_hw), lambda b, j: (b, 0, j)),
            pl.BlockSpec((None, C, t_hw), lambda b, j: (b, 0, j)),
        ],
        out_specs=pl.BlockSpec((None, C, t_hw), lambda b, j: (b, 0, j)),
        compiler_params=pltpu.CompilerParams(
            dimension_semantics=("parallel", "parallel"),
        ),
    )(xr, bits)

    out = out[:, :, :HW]
    return out.reshape(B, C, H, W)


if __name__ == "__main__":
    key = jax.random.PRNGKey(0)
    kx, knoise = jax.random.split(key)
    x = jax.random.normal(kx, (2, 4, 16, 16), dtype=jnp.float32)

    y = jax.block_until_ready(l2norm_pallas(x, knoise))

    # Light sanity checks (no output unless they fail).
    assert y.shape == x.shape and y.dtype == x.dtype
    assert bool(jnp.all(jnp.isfinite(y)))
    # Noise-free reference for the deterministic part.
    norm = jnp.sqrt(jnp.sum(x * x, axis=1, keepdims=True)) + EPS
    ref = 2.0 * x / norm
    resid = y - ref
    assert float(jnp.max(jnp.abs(resid))) < 1.0
    assert 0.01 < float(jnp.std(resid)) < 0.3

    # Ragged spatial size (exercises padding + squeezed batch dim + small C).
    x2 = jax.random.normal(kx, (2, 3, 10, 10), dtype=jnp.float32)
    y2 = jax.block_until_ready(l2norm_pallas(x2, knoise))
    assert y2.shape == x2.shape and bool(jnp.all(jnp.isfinite(y2)))

    print("KERNEL_OK")
</pallas_src>

<mosaic_0001>
module attributes {stable_mosaic.version = 11 : i64} {
  func.func @_l2norm_kernel(%arg0: i32, %arg1: i32, %arg2: memref<1x4x256xf32, #tpu.memory_space<vmem>>, %arg3: memref<1x4x256xi32, #tpu.memory_space<vmem>>, %arg4: memref<1x4x256xf32, #tpu.memory_space<vmem>>) attributes {dimension_semantics = [#tpu.dimension_semantics<parallel>, #tpu.dimension_semantics<parallel>], iteration_bounds = array<i64: 2, 1>, scalar_prefetch = 0 : i64, scratch_operands = 0 : i64, tpu.core_type = #tpu.core_type<tc>, window_params = [{transform_indices = @transform_0, window_bounds = array<i64: 1, 4, 256>}, {transform_indices = @transform_1, window_bounds = array<i64: 1, 4, 256>}, {transform_indices = @transform_2, window_bounds = array<i64: 1, 4, 256>}]} {
    %c0 = arith.constant 0 : index
    %c0_0 = arith.constant 0 : index
    %c0_1 = arith.constant 0 : index
    %0 = vector.load %arg2[%c0, %c0_0, %c0_1] : memref<1x4x256xf32, #tpu.memory_space<vmem>>, vector<1x4x256xf32>
    %1 = vector.shape_cast %0 : vector<1x4x256xf32> to vector<4x256xf32>
    %2 = arith.mulf %1, %1 : vector<4x256xf32>
    %cst = arith.constant dense<0.000000e+00> : vector<256xf32>
    %3 = vector.multi_reduction <add>, %2, %cst [0] : vector<4x256xf32> to vector<256xf32>
    %4 = vector.shape_cast %3 : vector<256xf32> to vector<1x256xf32>
    %5 = math.sqrt %4 : vector<1x256xf32>
    %cst_2 = arith.constant 1.000000e-10 : f32
    %6 = vector.broadcast %cst_2 : f32 to vector<1x256xf32>
    %7 = arith.addf %5, %6 : vector<1x256xf32>
    %cst_3 = arith.constant 2.000000e+00 : f32
    %8 = vector.broadcast %cst_3 : f32 to vector<1x256xf32>
    %9 = arith.divf %8, %7 : vector<1x256xf32>
    %10 = vector.broadcast %9 : vector<1x256xf32> to vector<4x256xf32>
    %11 = arith.mulf %1, %10 : vector<4x256xf32>
    %c0_4 = arith.constant 0 : index
    %c0_5 = arith.constant 0 : index
    %c0_6 = arith.constant 0 : index
    %12 = vector.load %arg3[%c0_4, %c0_5, %c0_6] : memref<1x4x256xi32, #tpu.memory_space<vmem>>, vector<1x4x256xi32>
    %13 = vector.shape_cast %12 : vector<1x4x256xi32> to vector<4x256xi32>
    %14 = vector.extract_strided_slice %13 {offsets = [0, 0], sizes = [4, 128], strides = [1, 1]} : vector<4x256xi32> to vector<4x128xi32>
    %15 = vector.extract_strided_slice %13 {offsets = [0, 128], sizes = [4, 128], strides = [1, 1]} : vector<4x256xi32> to vector<4x128xi32>
    %c9_i32 = arith.constant 9 : i32
    %16 = vector.broadcast %c9_i32 : i32 to vector<4x128xi32>
    %17 = arith.shrui %14, %16 : vector<4x128xi32>
    %c1065353216_i32 = arith.constant 1065353216 : i32
    %18 = vector.broadcast %c1065353216_i32 : i32 to vector<4x128xi32>
    %19 = arith.ori %17, %18 : vector<4x128xi32>
    %20 = tpu.bitcast %19 : vector<4x128xi32> -> vector<4x128xf32>
    %c9_i32_7 = arith.constant 9 : i32
    %21 = vector.broadcast %c9_i32_7 : i32 to vector<4x128xi32>
    %22 = arith.shrui %15, %21 : vector<4x128xi32>
    %c1065353216_i32_8 = arith.constant 1065353216 : i32
    %23 = vector.broadcast %c1065353216_i32_8 : i32 to vector<4x128xi32>
    %24 = arith.ori %22, %23 : vector<4x128xi32>
    %25 = tpu.bitcast %24 : vector<4x128xi32> -> vector<4x128xf32>
    %cst_9 = arith.constant 2.000000e+00 : f32
    %26 = vector.broadcast %cst_9 : f32 to vector<4x128xf32>
    %27 = arith.subf %26, %20 : vector<4x128xf32>
    %cst_10 = arith.constant 1.000000e+00 : f32
    %28 = vector.broadcast %cst_10 : f32 to vector<4x128xf32>
    %29 = arith.subf %25, %28 : vector<4x128xf32>
    %cst_11 = arith.constant 6.28318548 : f32
    %30 = vector.broadcast %cst_11 : f32 to vector<4x128xf32>
    %31 = arith.mulf %30, %29 : vector<4x128xf32>
    %32 = math.log %27 : vector<4x128xf32>
    %cst_12 = arith.constant -2.000000e+00 : f32
    %33 = vector.broadcast %cst_12 : f32 to vector<4x128xf32>
    %34 = arith.mulf %33, %32 : vector<4x128xf32>
    %35 = math.sqrt %34 : vector<4x128xf32>
    %36 = math.cos %31 : vector<4x128xf32>
    %37 = arith.mulf %35, %36 : vector<4x128xf32>
    %38 = math.sin %31 : vector<4x128xf32>
    %39 = arith.mulf %35, %38 : vector<4x128xf32>
    %40 = tpu.concatenate %37, %39 in 1 : vector<4x128xf32>, vector<4x128xf32> -> vector<4x256xf32>
    %cst_13 = arith.constant 1.000000e-01 : f32
    %41 = vector.broadcast %cst_13 : f32 to vector<4x256xf32>
    %42 = arith.mulf %41, %40 : vector<4x256xf32>
    %43 = arith.addf %11, %42 : vector<4x256xf32>
    %c0_14 = arith.constant 0 : index
    %c0_15 = arith.constant 0 : index
    %c0_16 = arith.constant 0 : index
    %44 = vector.load %arg4[%c0_14, %c0_15, %c0_16] : memref<1x4x256xf32, #tpu.memory_space<vmem>>, vector<1x4x256xf32>
    %45 = vector.shape_cast %44 : vector<1x4x256xf32> to vector<4x256xf32>
    %46 = vector.shape_cast %43 : vector<4x256xf32> to vector<1x4x256xf32>
    tpu.vector_store %arg4[%c0_14, %c0_15, %c0_16], %46 {strides = array<i32>} : memref<1x4x256xf32, #tpu.memory_space<vmem>>, vector<1x4x256xf32>,
    return
  }
  func.func @transform_0(%arg0: i32, %arg1: i32) -> (i32, i32, i32) {
    %c0_i32 = arith.constant 0 : i32
    %c0_i32_0 = arith.constant 0 : i32
    return %arg0, %c0_i32, %arg1 : i32, i32, i32
  }
  func.func @transform_1(%arg0: i32, %arg1: i32) -> (i32, i32, i32) {
    %c0_i32 = arith.constant 0 : i32
    %c0_i32_0 = arith.constant 0 : i32
    return %arg0, %c0_i32, %arg1 : i32, i32, i32
  }
  func.func @transform_2(%arg0: i32, %arg1: i32) -> (i32, i32, i32) {
    %c0_i32 = arith.constant 0 : i32
    %c0_i32_0 = arith.constant 0 : i32
    return %arg0, %c0_i32, %arg1 : i32, i32, i32
  }
}

</mosaic_0001>

<bundles_post_ra>
// kernel: tpu_custom_call.1
= control target key start
LH: loop header
LB: loop body
LE: loop exit
PB: predicated region body
PF: predicated region fallthrough
CT: control target
= control target key end

     0   :  { %7 = vsyncpa [#allocation3], 0  ;;  %s1194_s0 = inlined_call_operand.hbm [shape: f32[2,4,256], index: 0, kind: input, shape index: {}]   ;;  %s1195_s1 = inlined_call_operand.hbm [shape: u32[2,4,256], index: 1, kind: input, shape index: {}]   ;;  %s1196_s2 = inlined_call_operand.hbm [shape: f32[2,4,256], index: 2, kind: output, shape index: {}]  }
   0x1   :  { %9 = vsyncpa [#allocation3 + $0x1], 0 }
   0x2   :  { %10 = vsyncpa [#allocation6], 0 }
   0x3   :  { %12 = vsyncpa [#allocation6 + $0x1], 0 }
   0x4   :  { %13 = vsyncpa [#allocation4], 0 }
   0x5   :  { %15 = vsyncpa [#allocation4 + $0x1], 0  ;;  %s929_s9 = smov 0   ;;  %s931_s10 = smov 0  }
   0x6   :  { %s933_s11 = smov 0   ;;  %s935_s12 = smov 0  }
   0x7   :  { %s937_s13 = smov 0   ;;  %s939_s14 = smov 0  }
   0x8 LB: > { %s633_s15 = sadd.s32 4294967295, %s903_s14   ;;  %s634_s16 = sadd.s32 4294967294, %s903_s14   ;;  %s903_s14 = sphi %s939_s14, %s21_s14   ;;  %s899_s13 = sphi %s937_s13, %s1216_s13   ;;  %s895_s12 = sphi %s935_s12, %s1215_s12   ;;  %s891_s11 = sphi %s933_s11, %s1214_s11   ;;  %s887_s10 = sphi %s931_s10, %s1213_s10   ;;  %s883_s9 = sphi %s929_s9, %s1212_s9  }
   0x9   : > { %s33_s17 = sadd.s32 1, %s899_s13  ;;  %s42_s18 = sadd.s32 1, %s891_s11 }
   0xa   : > { %p35_p0 = scmp.ge.s32.totalorder %s33_s17, 2  ;;  %p49_p1 = scmp.ne.s32.totalorder %s891_s11, %s887_s10 }
   0xb   : > { %p50_p2 = scmp.eq.s32.totalorder %s903_s14, 0  ;;  %p55_p3 = scmp.ne.s32.totalorder %s887_s10, %s883_s9 }
   0xc   : > { %s1218_s17 = smov (%p35_p0, %s33_s17), 0  ;;  %p56_p5 = scmp.eq.s32.totalorder %s633_s15, 0 }
   0xd   : > { %p970_p4 = por %p50_p2, %p49_p1  ;;  %s37_s20 = ssub.s32 %s899_s13, %s1218_s17 }
   0xe   : > { %p109_p6 = scmp.eq.s32.totalorder %s633_s15, 1  ;;  %p40_p7 = scmp.eq.s32.totalorder %s37_s20, 0 }
   0xf   : > { %p976_p8 = por %p56_p5, %p55_p3  ;;  %p115_p10 = scmp.eq.s32.totalorder %s634_s16, 1 }
  0x10   : > { %p980_p9 = por %p109_p6, %p49_p1  ;;  %p685_p13 = scmp.lt.s32.totalorder %s903_s14, 2 }
  0x11   : > { %s1200_s21 = scalar_select %p976_p8, 1, 0 }
  0x12   : > { %s1201_s22 = scalar_select %p980_p9, 1, 0 }
  0x13   : > { %s985_s23 = scalar_select %p40_p7, %s891_s11, %s42_s18  }
  0x14   : > { %p987_p11 = por %p115_p10, %p55_p3  ;;  %s994_s25 = sand.u32 1, %s891_s11  }
  0x15   : > { %s637_s26 = sshll.u32 %s994_s25, 3  ;;  %s661_s27 = sshll.u32 %s899_s13, 7 }
  0x16   : > { %s1202_s24 = scalar_select %p987_p11, 1, 0 }
  0x17   : > { %s1003_s30 = scalar_lea.hbm %s1194_s0, %s661_s27  ;;  %s139_s3 = scalar_lea.vmem [#allocation2], %s637_s26 }
  0x18   : > { %s149_s4 = sshll.u32 %s139_s3, 4  ;;  %p1011_p0 = pnand %p685_p13, %p970_p4  ;;  %s1007_s4 = int_to_ptr.vmem [resolvable:$true] %s149_s4 }
  0x19   : > { %s136_s6 = scalar_lea.sflag [#allocation3], %s994_s25  ;;  %s757_s7 = scalar_lea.hbm %s1003_s30, 128 }
  0x1a   : > { %p758_p3 = scmp.ne.s32.totalorder %s1003_s30, %s757_s7  ;;  %p759_p5 = pneg %p1011_p0 }
  0x1b   : > { %s762_s16 = scalar_lea.hbm %s1194_s0, 256  ;;  %p763_p4 = scmp.lt.u32.totalorder %s1003_s30, %s1194_s0 }
  0x1c   : > { %p760_p6 = pnand %p759_p5, %p758_p3  ;;  %p764_p10 = scmp.lt.u32.totalorder %s762_s16, %s757_s7 }
  0x1d   : > { %p766_p12 = scmp.lt.u32.totalorder %s757_s7, %s1003_s30 }
  0x1e   : > { %p761_p7 = pneg %p760_p6  ;;  %p765_p13 = por %p764_p10, %p763_p4 }
  0x20   : > { %p767_p1 = por %p766_p12, %p765_p13 }
  0x22   : > { %p768_p2 = pnand %p767_p1, %p761_p7 }
  0x24   : > { %771 = shalt.err (!%p768_p2)
}
  0x25   : > { %s772_s20 = scalar_lea.vmem %s1007_s4, 128  ;;  %s905_s28 = smov [#allocation2]  }
  0x26   : > { %p773_p3 = scmp.ne.s32.totalorder %s1007_s4, %s772_s20  ;;  %s777_s29 = sshll.u32 %s905_s28, 4  ;;  %s778_s29 = int_to_ptr.vmem [resolvable:$false] %s777_s29 }
  0x27   : > { %s779_s3 = scalar_lea.vmem %s778_s29, 256  ;;  %p780_p9 = scmp.lt.s32.totalorder %s1007_s4, %s778_s29 }
  0x28   : > { %p775_p6 = pnand %p773_p3, %p759_p5  ;;  %p781_p4 = scmp.lt.s32.totalorder %s779_s3, %s772_s20 }
  0x2a   : > { %p776_p11 = pneg %p775_p6  ;;  %p782_p10 = por %p781_p4, %p780_p9 }
  0x2c   : > { %p783_p12 = pnand %p782_p10, %p776_p11 }
  0x2e   : > { %786 = shalt.err (!%p783_p12)
}
  0x2f   : > { %677 = dma.hbm_to_vmem [thread:$0]  (!%p1011_p0), %s1003_s30, 128, %s1007_s4, %s136_s6  }
  0x30   : > { %p1204_p1 = scmp.lt.s32.totalorder %s903_s14, 3  ;;  %p1205_p2 = scmp.ge.s32.totalorder %s903_s14, 1 }
  0x31   : > { %s1056_s16 = scalar_lea.hbm %s1195_s1, %s661_s27  ;;  %s160_s18 = scalar_lea.vmem [#allocation5], %s637_s26 }
  0x32   : > { %p1047_p7 = pnand %p1205_p2, %p1204_p1  ;;  %s170_s19 = sshll.u32 %s160_s18, 4  ;;  %s171_s19 = int_to_ptr.vmem [resolvable:$true] %s170_s19 }
  0x33   : > { %s157_s30 = scalar_lea.sflag [#allocation6], %s994_s25  ;;  %s787_s4 = scalar_lea.hbm %s1056_s16, 128 }
  0x34   : > { %s1206_s7 = scalar_select %p1047_p7, 1, 0 }
  0x35   : > { %p788_p9 = scmp.ne.s32.totalorder %s1056_s16, %s787_s4  ;;  %s792_s27 = scalar_lea.hbm %s1195_s1, 256 }
  0x36   : > { %p793_p3 = scmp.lt.u32.totalorder %s1056_s16, %s1195_s1  ;;  %p794_p6 = scmp.lt.u32.totalorder %s792_s27, %s787_s4 }
  0x37   : > { %p790_p11 = pnand %p788_p9, %p759_p5  ;;  %p796_p10 = scmp.lt.u32.totalorder %s787_s4, %s1056_s16 }
  0x38   : > { %p795_p4 = por %p794_p6, %p793_p3 }
  0x39   : > { %p791_p13 = pneg %p790_p11 }
  0x3a   : > { %p797_p12 = por %p796_p10, %p795_p4 }
  0x3c   : > { %p798_p1 = pnand %p797_p12, %p791_p13 }
  0x3e   : > { %801 = shalt.err (!%p798_p1)
}
  0x3f   : > { %s802_s25 = scalar_lea.vmem %s171_s19, 128  ;;  %s906_s26 = smov [#allocation5]  }
  0x40   : > { %p803_p2 = scmp.ne.s32.totalorder %s171_s19, %s802_s25  ;;  %s807_s3 = sshll.u32 %s906_s26, 4  ;;  %s808_s3 = int_to_ptr.vmem [resolvable:$false] %s807_s3 }
  0x41   : > { %s809_s8 = scalar_lea.vmem %s808_s3, 256  ;;  %p810_p8 = scmp.lt.s32.totalorder %s171_s19, %s808_s3 }
  0x42   : > { %p805_p9 = pnand %p803_p2, %p759_p5  ;;  %p811_p7 = scmp.lt.s32.totalorder %s809_s8, %s802_s25 }
  0x44   : > { %p806_p11 = pneg %p805_p9  ;;  %p812_p3 = por %p811_p7, %p810_p8 }
  0x46   : > { %p813_p6 = pnand %p812_p3, %p806_p11 }
  0x48   : > { %816 = shalt.err (!%p813_p6)
}
  0x49   : > { %680 = dma.hbm_to_vmem [thread:$0]  (!%p1011_p0), %s1056_s16, 128, %s171_s19, %s157_s30  }
  0x4a   : > { %p1207_p13 = scmp.ne.s32.totalorder %s1206_s7, 0 }
  0x4b   : > { %s1083_s15 = sand.u32 (!%p1207_p13), 1, %s887_s10   ;;  %p1208_p8 = scmp.ne.s32.totalorder (!%p1207_p13), %s1200_s21, 0 }
  0x4c   : > { %179 = sbr.rel (%p1207_p13) target bundleno = 199 (0xc7), region = 28  ;;  %s1086_s18 = sshll.u32 (!%p1207_p13), %s1083_s15, 3 }
  0x4d   : > { %s182_s4 = scalar_lea.sflag (!%p1207_p13), [#allocation3], %s1083_s15  ;;  %s185_s6 = scalar_lea.vmem (!%p1207_p13), [#allocation2], %s1086_s18 }
  0x53   : > { %870 = dma.done.wait (%p1208_p8), %s182_s4, 128  }
  0x54   : > { %872 = vsyncadd (%p1208_p8), %s182_s4, 4294967168  ;;  %s191_s5 = scalar_lea.sflag [#allocation6], %s1083_s15  ;;  %s194_s7 = scalar_lea.vmem [#allocation5], %s1086_s18 }
  0x55   : > { %874 = dma.done.wait (%p1208_p8), %s191_s5, 128  }
  0x56   : > { %876 = vsyncadd (%p1208_p8), %s191_s5, 4294967168  ;;  %v1100_v0 = vld [vmem:[%s194_s7] sm:$0xff]  ;;  %v1105_v6 = vld [vmem:[%s185_s6] sm:$0xff]  ;;  %vm228_vm0 = vcmask 1043456   ;;  %v907_v22 = vmov 683565275  }
  0x57   : > { %v272_v1 = vrot.slane %v1100_v0, 4  ;;  %v224_v9 = vmul.f32 %v1105_v6, %v1105_v6  ;;  %v908_v24 = vmov 2475754826   ;;  %v909_v26 = vmov 2131351028   ;;  %s219_s21 = scalar_lea.vmem [#allocation7], %s1086_s18 }
  0x58   : > { %v910_v30 = vmov 2102212464   ;;  %v911_v32 = vmov 920167782   ;;  %v912_v40 = vmov 1326507024  }
  0x59   : > { %v273_v2 = vshrl.u32 %v272_v1, 9  ;;  %v226_v12 = vcombine.high %v224_v9, %v224_v9  ;;  %v229_v13 = vsel %vm228_vm0, %v224_v9, 0.0  ;;  %s523_s16 = sshll.u32 %s219_s21, 4  ;;  %s663_s19 = sshll.u32 %s895_s12, 7  ;;  %s1142_s16 = int_to_ptr.vmem [resolvable:$true] %s523_s16 }
  0x5a   : > { %v230_v16 = vrot.slane %v229_v13, 4  ;;  %s1147_s27 = scalar_lea.hbm %s1196_s2, %s663_s19  ;;  %s507_s28 = scalar_lea.sflag [#allocation4], %s1083_s15 }
  0x5b   : > { %v274_v3 = vor.u32 1065353216, %v273_v2  ;;  %v236_v18 = vsel %vm228_vm0, %v226_v12, 0.0  ;;  %s817_s29 = scalar_lea.vmem %s1142_s16, 128  ;;  %p1209_p5 = scmp.ne.s32.totalorder %s1201_s22, 0 }
  0x5c   : > { %v231_v28 = vadd.f32 %v230_v16, %v229_v13  ;;  %v237_v29 = vrot.slane %v236_v18, 4  ;;  %p818_p0 = scmp.ne.s32.totalorder %s1142_s16, %s817_s29  ;;  %s913_s12 = smov [#allocation7]  }
  0x5d   : > { %v647_v4 = vadd.f32 -1.0, %v274_v3  ;;  %s821_s25 = sshll.u32 %s913_s12, 4  ;;  %s822_s25 = int_to_ptr.vmem [resolvable:$false] %s821_s25 }
  0x5e   : > { %v238_v45 = vadd.f32 %v237_v29, %v236_v18  ;;  %v232_v51 = vrot.slane %v231_v28, 2  ;;  %p819_p7 = pnand %p818_p0, %p1209_p5  ;;  %s823_s26 = scalar_lea.vmem %s822_s25, 256 }
  0x5f   : > { %v1103_v5 = vmul.f32 6.2831855, %v647_v4  ;;  %p824_p10 = scmp.lt.s32.totalorder %s1142_s16, %s822_s25  ;;  %p825_p12 = scmp.lt.s32.totalorder %s823_s26, %s817_s29 }
  0x60   : > { %v239_v57 = vrot.slane %v238_v45, 2  ;;  %v233_v2 = vadd.f32 %v232_v51, %v231_v28  ;;  %p820_p4 = pneg %p819_p7 }
  0x61   : > { %v292_v7 = vand.u32 2139095040, %v1103_v5  ;;  %v289_v14 = vand.u32 2147483647, %v1103_v5  ;;  %vm291_vm12 = vcmp.lt.s32.totalorder %v1103_v5, 0  ;;  %p826_p1 = por %p825_p12, %p824_p10 }
  0x63   : > { %v293_v8 = vshrl.u32 %v292_v7, 23  ;;  %v296_v19 = vand.u32 8388607, %v289_v14  ;;  %v240_v7 = vadd.f32 %v239_v57, %v238_v45  ;;  %vm290_vm13 = vcmp.le.f32.partialorder %v289_v14, 0.7853982  ;;  %p827_p2 = pnand %p826_p1, %p820_p4 }
  0x65   : > { %v648_v10 = vadd.s32 4294967169, %v293_v8  ;;  %v297_v34 = vor.u32 8388608, %v296_v19  ;;  %v269_v8 = vshrl.u32 %v1100_v0, 9  ;;  %v241_v12 = vrot.slane %v240_v7, 1 }
  0x67   : > { %v299_v11 = vadd.s32 1, %v648_v10  ;;  %v337_v50 = vshll.u32 %v297_v34, 8  ;;  %v242_v19 = vadd.f32 %v241_v12, %v240_v7 }
  0x69   : > { %vm300_vm1 = vcmp.gt.s32.totalorder %v299_v11, 0  ;;  %vm252_vm9 = vcmp.eq.f32.partialorder %v242_v19, inf  ;;  %vm254_vm11 = vcmp.eq.f32.partialorder %v242_v19, 0.0 }
  0x6a   : > { %v301_v15 = vsel %vm300_vm1, %v299_v11, 0  ;;  %v234_v11 = vrot.slane %v233_v2, 1 }
  0x6b   : > { %v303_v17 = vand.u32 31, %v301_v15  ;;  %v302_v20 = vshrl.u32 %v301_v15, 5  ;;  %v270_v15 = vor.u32 1065353216, %v269_v8 }
  0x6d   : > { %v304_v21 = vsub.s32 32, %v303_v17  ;;  %v306_v23 = vshll.u32 %v907_v22, %v303_v17  ;;  %v309_v25 = vshll.u32 %v908_v24, %v303_v17  ;;  %v312_v27 = vshll.u32 %v909_v26, %v303_v17 }
  0x6e   : > { %v315_v31 = vshll.u32 %v910_v30, %v303_v17  ;;  %v318_v33 = vshll.u32 %v911_v32, %v303_v17  ;;  %vm321_vm2 = vcmp.lt.s32.totalorder %v302_v20, 1  ;;  %vm324_vm3 = vcmp.lt.s32.totalorder %v302_v20, 4 }
  0x6f   : > { %v307_v35 = vshrl.u32 %v908_v24, %v304_v21  ;;  %v310_v36 = vshrl.u32 %v909_v26, %v304_v21  ;;  %v313_v37 = vshrl.u32 %v910_v30, %v304_v21  ;;  %v305_v38 = vshrl.u32 %v907_v22, %v304_v21 }
  0x70   : > { %v316_v39 = vshrl.u32 %v911_v32, %v304_v21  ;;  %v319_v41 = vshrl.u32 %v912_v40, %v304_v21  ;;  %vm323_vm4 = vcmp.lt.s32.totalorder %v302_v20, 3  ;;  %vm322_vm5 = vcmp.lt.s32.totalorder %v302_v20, 2 }
  0x71   : > { %v308_v42 = vor.u32 %v307_v35, %v306_v23  ;;  %v311_v43 = vor.u32 %v310_v36, %v309_v25  ;;  %v314_v44 = vor.u32 %v313_v37, %v312_v27  ;;  %v235_v17 = vadd.f32 %v234_v11, %v233_v2 }
  0x72   : > { %v317_v46 = vor.u32 %v316_v39, %v315_v31  ;;  %v320_v47 = vor.u32 %v319_v41, %v318_v33  ;;  %v276_v20 = vsub.f32 2.0, %v270_v15 }
  0x73   : > { %v326_v48 = vsel %vm324_vm3, %v314_v44, 2102212464  ;;  %v329_v49 = vsel %vm321_vm2, %v308_v42, %v311_v43  ;;  %v325_v53 = vsel %vm321_vm2, %v305_v38, %v308_v42  ;;  %v333_v56 = vsel %vm321_vm2, %v311_v43, %v314_v44 }
  0x74   : > { %v330_v52 = vsel %vm324_vm3, %v317_v46, 920167782  ;;  %v327_v54 = vsel %vm323_vm4, %v311_v43, %v326_v48  ;;  %v334_v59 = vsel %vm324_vm3, %v320_v47, 1326507024  ;;  %741 = vrsqrt.f32 %v235_v17 }
  0x75   : > { %v331_v55 = vsel %vm323_vm4, %v314_v44, %v330_v52  ;;  %v335_v60 = vsel %vm323_vm4, %v317_v46, %v334_v59  ;;  %v328_v63 = vsel %vm322_vm5, %v325_v53, %v327_v54  ;;  %743 = vrsqrt.f32 %v242_v19 }
  0x76   : > { %v332_v58 = vsel %vm322_vm5, %v329_v49, %v331_v55  ;;  %v336_v1 = vsel %vm322_vm5, %v333_v56, %v335_v60  ;;  %v344_v9 = vmul.u32 %v337_v50, %v328_v63  ;;  %745 = vlog2.f32 %v276_v20 }
  0x77   : > { %v1120_v61 = vmul.u32.u64.low %v337_v50, %v332_v58  ;;  %v1121_v62 = vmul.u32.u64.high %v337_v50, %v332_v58, %v1120_v61  ;;  %v1125_v3 = vmul.u32.u64.low %v337_v50, %v336_v1  ;;  %v1126_v4 = vmul.u32.u64.high %v337_v50, %v336_v1, %v1125_v3 }
  0x78   : > { %vm245_vm8 = vcmp.eq.f32.partialorder %v235_v17, inf  ;;  %v248_v38 = vand.u32 2147483648, %v235_v17  ;;  %vm247_vm10 = vcmp.eq.f32.partialorder %v235_v17, 0.0  ;;  %v255_v42 = vand.u32 2147483648, %v242_v19 }
  0x79   : > { %v347_v10 = vadd.s32 1, %v1121_v62  ;;  %vm346_vm6 = vc.u32 %v1126_v4, %v1120_v61  ;;  %v345_v30 = vadd.s32 %v1120_v61, %v1126_v4 }
  0x7b   : > { %v348_v13 = vsel %vm346_vm6, %v347_v10, %v1121_v62  ;;  %vm381_vm6 = vweird.f32 %v1103_v5 }
  0x7c   : > { %v349_v16 = vadd.s32 %v348_v13, %v344_v9 }
  0x7e   : > { %v350_v18 = vadd.s32 536870912, %v349_v16  ;;  %v742_v26 = vpop.eup %741 }
  0x7f   : > { %v744_v28 = vpop.eup %743  ;;  %v244_v31 = vmul.f32 %v742_v26, %v235_v17 }
  0x80   : > { %v351_v21 = vshrl.u32 %v350_v18, 30  ;;  %v746_v29 = vpop.eup %745  ;;  %v251_v33 = vmul.f32 %v744_v28, %v242_v19 }
  0x81   : > { %v280_v37 = vmul.f32 0.6931472, %v746_v29  ;;  %v246_v41 = vsel %vm245_vm8, %v235_v17, %v244_v31 }
  0x82   : > { %v352_v22 = vshll.u32 %v351_v21, 30  ;;  %v253_v43 = vsel %vm252_vm9, %v242_v19, %v251_v33  ;;  %v249_v47 = vsel %vm247_vm10, %v248_v38, %v246_v41  ;;  %v375_v52 = vsub.s32 4, %v351_v21 }
  0x83   : > { %v281_v46 = vmul.f32 -2.0, %v280_v37  ;;  %v256_v50 = vsel %vm254_vm11, %v255_v42, %v253_v43  ;;  %v257_v53 = vadd.f32 1e-10, %v249_v47 }
  0x84   : > { %v353_v0 = vsub.s32 %v349_v16, %v352_v22  ;;  %v258_v54 = vadd.f32 1e-10, %v256_v50  ;;  %v376_v57 = vsel %vm291_vm12, %v375_v52, %v351_v21 }
  0x85   : > { %747 = vrsqrt.f32 %v281_v46  ;;  %v378_v60 = vsel %vm290_vm13, 0, %v376_v57  ;;  %vm284_vm14 = vcmp.eq.f32.partialorder %v281_v46, inf  ;;  %vm286_vm15 = vcmp.eq.f32.partialorder %v281_v46, 0.0 }
  0x86   : > { %v355_v23 = vsub.s32 0, %v353_v0  ;;  %749 = vrcp.f32 %v257_v53  ;;  %v486_v61 = vadd.s32 3, %v378_v60  ;;  %v382_v1 = vand.u32 3, %v378_v60 }
  0x87   : > { %751 = vrcp.f32 %v258_v54  ;;  %v287_v14 = vand.u32 2147483648, %v281_v46 }
  0x88   : > { %v649_v24 = vmin.u32 %v355_v23, %v353_v0  ;;  %v487_v2 = vand.u32 3, %v486_v61  ;;  %vm387_vm0 = vcmp.eq.s32.totalorder %v382_v1, 2  ;;  %vm384_vm2 = vcmp.eq.s32.totalorder %v382_v1, 0 }
  0x89   : > { %vm383_vm4 = vcmp.lt.s32.totalorder %v382_v1, 2 }
  0x8a   : > { %v357_v25 = vclz %v649_v24  ;;  %vm492_vm1 = vcmp.eq.s32.totalorder %v487_v2, 2  ;;  %vm489_vm3 = vcmp.eq.s32.totalorder %v487_v2, 0  ;;  %vm488_vm5 = vcmp.lt.s32.totalorder %v487_v2, 2 }
  0x8c   : > { %v650_v27 = vadd.s32 4294967294, %v357_v25 }
  0x8e   : > { %vm651_vm7 = vcmp.lt.s32.totalorder %v650_v27, 0 }
  0x8f   : > { %v360_v32 = vsel %vm651_vm7, 0, %v650_v27  ;;  %v748_v62 = vpop.eup %747 }
  0x90   : > { %v361_v34 = vsub.s32 32, %v360_v32  ;;  %v362_v35 = vshll.u32 %v353_v0, %v360_v32  ;;  %v365_v36 = vsub.s32 4294967266, %v360_v32  ;;  %v283_v63 = vmul.f32 %v748_v62, %v281_v46  ;;  %v750_v3 = vpop.eup %749 }
  0x91   : > { %v752_v4 = vpop.eup %751  ;;  %v260_v8 = vmul.f32 2.0, %v750_v3 }
  0x92   : > { %v363_v39 = vshrl.u32 %v345_v30, %v361_v34  ;;  %v366_v40 = vadd.s32 127, %v365_v36  ;;  %v285_v9 = vsel %vm284_vm14, %v281_v46, %v283_v63  ;;  %v262_v11 = vmul.f32 2.0, %v752_v4 }
  0x93   : > { %v288_v17 = vsel %vm286_vm15, %v287_v14, %v285_v9 }
  0x94   : > { %v364_v44 = vor.u32 %v363_v39, %v362_v35  ;;  %v367_v45 = vshll.u32 %v366_v40, 23  ;;  %v265_v20 = vcombine.low %v260_v8, %v262_v11 }
  0x96   : > { %v368_v48 = vor.u32 4788187, %v367_v45  ;;  %v371_v49 = vcvt.s32.f32 %v364_v44  ;;  %v267_v26 = vmul.f32 %v265_v20, %v1105_v6 }
  0x98   : > { %v369_v51 = vand.u32 2147483647, %v368_v48 }
  0x9a   : > { %v372_v55 = vmul.f32 %v371_v49, %v369_v51 }
  0x9c   : > { %v373_v56 = vxor.u32 2147483648, %v372_v55 }
  0x9e   : > { %v374_v58 = vsel %vm291_vm12, %v373_v56, %v372_v55 }
  0x9f   : > { %v377_v59 = vsel %vm290_vm13, %v1103_v5, %v374_v58 }
  0xa0   : > { %753 = vcosq.f32 %v377_v59 }
  0xa1   : > { %755 = vsinq.f32 %v377_v59 }
  0xaa   : > { %v754_v7 = vpop.eup %753 }
  0xab   : > { %v756_v10 = vpop.eup %755  ;;  %v388_v12 = vxor.u32 2147483648, %v754_v7 }
  0xac   : > { %v385_v13 = vxor.u32 2147483648, %v756_v10 }
  0xad   : > { %v389_v15 = vsel %vm387_vm0, %v388_v12, %v756_v10  ;;  %v494_v16 = vsel %vm492_vm1, %v388_v12, %v756_v10 }
  0xae   : > { %v386_v18 = vsel %vm384_vm2, %v754_v7, %v385_v13  ;;  %v491_v19 = vsel %vm489_vm3, %v754_v7, %v385_v13 }
  0xaf   : > { %v390_v21 = vsel %vm383_vm4, %v386_v18, %v389_v15  ;;  %v495_v22 = vsel %vm488_vm5, %v491_v19, %v494_v16 }
  0xb0   : > { %v391_v0 = vsel %vm381_vm6, nan, %v390_v21  ;;  %v496_v23 = vsel %vm381_vm6, nan, %v495_v22 }
  0xb1   : > { %v392_v24 = vmul.f32 %v391_v0, %v288_v17  ;;  %v497_v25 = vmul.f32 %v496_v23, %v288_v17 }
  0xb3   : > { %v498_v5 = vmul.f32 0.1, %v392_v24  ;;  %v499_v27 = vmul.f32 0.1, %v497_v25 }
  0xb5   : > { %v502_v28 = vcombine.low %v498_v5, %v499_v27 }
  0xb7   : > { %v504_v29 = vadd.f32 %v502_v28, %v267_v26 }
  0xb9   : > { %505 = vst [vmem:[%s219_s21] sm:$0xff] %v504_v29 }
  0xba   : > { %830 = shalt.err (!%p827_p2)
}
  0xbb   : > { %s831_s3 = scalar_lea.hbm %s1147_s27, 128  ;;  %s835_s18 = scalar_lea.hbm %s1196_s2, 256 }
  0xbc   : > { %p832_p9 = scmp.ne.s32.totalorder %s1147_s27, %s831_s3  ;;  %p836_p6 = scmp.lt.u32.totalorder %s1147_s27, %s1196_s2 }
  0xbd   : > { %p837_p13 = scmp.lt.u32.totalorder %s835_s18, %s831_s3  ;;  %p839_p0 = scmp.lt.u32.totalorder %s831_s3, %s1147_s27 }
  0xbe   : > { %p833_p11 = pnand %p832_p9, %p1209_p5 }
  0xbf   : > { %p838_p8 = por %p837_p13, %p836_p6 }
  0xc0   : > { %p834_p3 = pneg %p833_p11 }
  0xc1   : > { %p840_p7 = por %p839_p0, %p838_p8 }
  0xc3   : > { %p841_p4 = pnand %p840_p7, %p834_p3 }
  0xc5   : > { %844 = shalt.err (!%p841_p4)
}
  0xc6   : > { %672 = dma.vmem_to_hbm [thread:$0]  (%p1209_p5), %s1142_s16, 128, %s1147_s27, %s507_s28  }
  0xc7 PF: > { %s535_s5 = sand.u32 1, %s883_s9   ;;  %p1210_p10 = scmp.ne.s32.totalorder %s1202_s24, 0 }
  0xc8   : > { %p1211_p12 = scmp.ge.s32.totalorder %s903_s14, 2  ;;  %s536_s7 = scalar_lea.sflag [#allocation4], %s535_s5 }
  0xca   : > { %p682_p1 = pnand %p1211_p12, %p1210_p10 }
  0xcc   : > { %878 = dma.done.wait (!%p682_p1), %s536_s7, 128  }
  0xcd   : > { %880 = vsyncadd (!%p682_p1), %s536_s7, 4294967168  ;;  %s21_s14 = sadd.s32 1, %s903_s14   ;;  %s1212_s9 = smov %s887_s10 }
  0xce   : > { %p18_p2 = scmp.ge.s32.totalorder %s21_s14, 4   ;;  %s1213_s10 = smov %s891_s11 }
  0xcf   : > { %s1214_s11 = smov %s985_s23  ;;  %s1215_s12 = smov %s899_s13 }
  0xd0   : > { %s1216_s13 = smov %s1218_s17  ;;  %20 = sbr.rel (!%p18_p2) target bundleno = 8 (0x8), region = 86 }
  0xd7   :  { %541 = vsyncpa [#allocation3], 1 }
  0xd8   :  { %543 = vsyncpa [#allocation3 + $0x1], 1 }
  0xd9   :  { %544 = vsyncpa [#allocation6], 1 }
  0xda   :  { %546 = vsyncpa [#allocation6 + $0x1], 1 }
  0xdb   :  { %547 = vsyncpa [#allocation4], 1 }
  0xdc   :  { %549 = vsyncpa [#allocation4 + $0x1], 1 }

</bundles_post_ra>
